<compile_context>
chip_gen: v6e
topology: v6e:2x2x1
jax: 0.10.0
libtpu: 0.0.40
codegen_flags: <defaults>
</compile_context>

<pallas_src>
import jax
import jax.numpy as jnp
from jax import lax
from jax.experimental import pallas as pl
from jax.experimental.pallas import tpu as pltpu

BN_EPS = 1e-5
LANE = 128
SUBLANE = 8
MAX_NODE_TILE = 512  # review: 512-1024; multiple of 256; fits v5e 16 MiB scoped VMEM


def _ceil_to(x, m):
    return ((x + m - 1) // m) * m


def _pad2(a, rows, cols):
    return jnp.pad(a, ((0, rows - a.shape[0]), (0, cols - a.shape[1])))


def _vmem_limit(nbytes):
    # Explicit scoped-VMEM budget with headroom: fails loudly if a tile sweep
    # outgrows the chip (v7x: 64 MiB physical / 32 MiB default, v5e: 16 MiB default).
    return max(int(1.5 * nbytes) + (2 << 20), 16 << 20)


# ---------------- Pass 1: Linear (bf16 MXU) + partial BN stats per parallel chunk ----------------
def _linear_stats_kernel(x_ref, wT_ref, h_ref, stats_ref):
    j = pl.program_id(1)

    # MXU: bf16 operands, f32 accumulate.
    h = jnp.dot(x_ref[...], wT_ref[...], preferred_element_type=jnp.float32)
    h_ref[...] = h.astype(h_ref.dtype)          # bf16 storage (stats use f32 h below)

    @pl.when(j == 0)
    def _():
        stats_ref[...] = jnp.zeros_like(stats_ref)

    # Only the live rows are touched: row 0 = sum, row 1 = sum of squares.
    # Padded node rows of x produce h == 0 and contribute nothing (exact).
    stats_ref[0:1, :] += jnp.sum(h, axis=0, keepdims=True)
    stats_ref[1:2, :] += jnp.sum(h * h, axis=0, keepdims=True)


# ---------------- Pass 2: fused BN affine + per-source degree norm, cast to bf16 once ----------------
def _src_kernel(scale_ref, shift_ref, h_ref, norml_ref, src_ref):
    h = h_ref[...].astype(jnp.float32)
    src = (h * scale_ref[...] + shift_ref[...]) * norml_ref[...]
    src_ref[...] = src.astype(src_ref.dtype)


# ---------------- Pass 3: adj^T aggregation (bf16 MXU), per-destination degree norm ----------------
def _agg_kernel(adj_ref, src_ref, normr_ref, out_ref):
    j = pl.program_id(1)

    @pl.when(j == 0)
    def _():
        out_ref[...] = jnp.zeros_like(out_ref)

    # adj block is read un-transposed with rows = source tile j, cols = dest tile i
    # (index_map (j, i)); contract dim 0 of both operands => (dst, f) partial sums.
    # Accumulate directly into the resident f32 output block (no VMEM scratch).
    out_ref[...] += lax.dot_general(
        adj_ref[...], src_ref[...],
        dimension_numbers=(((0,), (0,)), ((), ())),
        preferred_element_type=jnp.float32)

    @pl.when(j == pl.num_programs(1) - 1)
    def _():
        out_ref[...] = out_ref[...] * normr_ref[...]


def imlinear_bn(features, weight, gamma, beta, adj):
    """features: (N, F_in), weight: (F_out, F_in), gamma/beta: (F_out,), adj: (N, N) 0/1."""
    N, f_in = features.shape
    f_out = weight.shape[0]

    # Lane-dense padded shapes / node tiling.
    f_in_p = _ceil_to(f_in, LANE)
    f_out_p = _ceil_to(f_out, LANE)
    tile_n = min(MAX_NODE_TILE, _ceil_to(N, SUBLANE))
    n_tiles = -(-N // tile_n)
    n_par = 2 if n_tiles >= 2 else 1            # parallel stats chunks (v7x megacore)
    tiles_per_par = -(-n_tiles // n_par)
    n_tiles = n_par * tiles_per_par
    n_p = n_tiles * tile_n

    # bf16 casts BEFORE padding; 0/1 adjacency is exact in bf16. No wrapper transpose.
    x_p = _pad2(features.astype(jnp.bfloat16), n_p, f_in_p)
    wT_p = _pad2(weight.astype(jnp.bfloat16).T, f_in_p, f_out_p)
    adj_p = _pad2(adj.astype(jnp.bfloat16), n_p, n_p)

    # Degree norms as f32 columns (padded rows -> 0), computed once in the wrapper.
    adj_f32 = adj.astype(jnp.float32)
    out_deg = jnp.sum(adj_f32, axis=1)
    in_deg = jnp.sum(adj_f32, axis=0)
    norm_l_p = _pad2(lax.rsqrt(jnp.maximum(out_deg, 1.0)).reshape(N, 1), n_p, 1)
    norm_r_p = _pad2(lax.rsqrt(jnp.maximum(in_deg, 1.0)).reshape(N, 1), n_p, 1)

    # Explicit double-buffered VMEM budgets per pass.
    p1_vmem = 2 * (tile_n * f_in_p * 2 + f_in_p * f_out_p * 2
                   + tile_n * f_out_p * 2 + SUBLANE * f_out_p * 4)
    p2_vmem = 2 * (2 * SUBLANE * f_out_p * 4 + tile_n * f_out_p * 2
                   + tile_n * LANE * 4 + tile_n * f_out_p * 2)
    p3_vmem = 2 * (tile_n * tile_n * 2 + tile_n * f_out_p * 2
                   + tile_n * LANE * 4 + tile_n * f_out_p * 4)

    # -------- Pass 1: h = x @ W^T (bf16 stored) + per-chunk partial BN stats --------
    h, stats = pl.pallas_call(
        _linear_stats_kernel,
        out_shape=(jax.ShapeDtypeStruct((n_p, f_out_p), jnp.bfloat16),
                   jax.ShapeDtypeStruct((n_par * SUBLANE, f_out_p), jnp.float32)),
        grid_spec=pltpu.PrefetchScalarGridSpec(
            num_scalar_prefetch=0,
            grid=(n_par, tiles_per_par),
            in_specs=[
                pl.BlockSpec((tile_n, f_in_p),
                             lambda c, j: (c * tiles_per_par + j, 0)),
                pl.BlockSpec((f_in_p, f_out_p), lambda c, j: (0, 0)),
            ],
            out_specs=(
                pl.BlockSpec((tile_n, f_out_p),
                             lambda c, j: (c * tiles_per_par + j, 0)),
                pl.BlockSpec((SUBLANE, f_out_p), lambda c, j: (c, 0)),
            )),
        compiler_params=pltpu.CompilerParams(
            dimension_semantics=("parallel", "arbitrary"),
            vmem_limit_bytes=_vmem_limit(p1_vmem)),
    )(x_p, wT_p)

    # -------- Tiny combine (O(f_out)): fused BN affine from partial stats --------
    s = stats.reshape(n_par, SUBLANE, f_out_p)
    mean = jnp.sum(s[:, 0, :], axis=0, keepdims=True) / N
    ex2 = jnp.sum(s[:, 1, :], axis=0, keepdims=True) / N
    var = jnp.maximum(ex2 - mean * mean, 0.0)          # clamp: E[x^2]-E[x]^2 can go <0 in f32
    gamma_p = _pad2(gamma.reshape(1, f_out).astype(jnp.float32), 1, f_out_p)
    beta_p = _pad2(beta.reshape(1, f_out).astype(jnp.float32), 1, f_out_p)
    scale = gamma_p * lax.rsqrt(var + BN_EPS)
    shift = beta_p - mean * scale

    # -------- Pass 2: src = ((h*scale + shift) * norm_l) as bf16, computed once --------
    src = pl.pallas_call(
        _src_kernel,
        out_shape=jax.ShapeDtypeStruct((n_p, f_out_p), jnp.bfloat16),
        grid_spec=pltpu.PrefetchScalarGridSpec(
            num_scalar_prefetch=0,
            grid=(n_tiles,),
            in_specs=[
                pl.BlockSpec((1, f_out_p), lambda i: (0, 0)),
                pl.BlockSpec((1, f_out_p), lambda i: (0, 0)),
                pl.BlockSpec((tile_n, f_out_p), lambda i: (i, 0)),
                pl.BlockSpec((tile_n, 1), lambda i: (i, 0)),
            ],
            out_specs=pl.BlockSpec((tile_n, f_out_p), lambda i: (i, 0))),
        compiler_params=pltpu.CompilerParams(
            dimension_semantics=("parallel",),
            vmem_limit_bytes=_vmem_limit(p2_vmem)),
    )(scale, shift, h, norm_l_p)

    # -------- Pass 3: aggregation (dst tiles parallel, src tiles reduced into out block) --------
    out_p = pl.pallas_call(
        _agg_kernel,
        out_shape=jax.ShapeDtypeStruct((n_p, f_out_p), jnp.float32),
        grid_spec=pltpu.PrefetchScalarGridSpec(
            num_scalar_prefetch=0,
            grid=(n_tiles, n_tiles),
            in_specs=[
                pl.BlockSpec((tile_n, tile_n), lambda i, j: (j, i)),   # un-transposed adj
                pl.BlockSpec((tile_n, f_out_p), lambda i, j: (j, 0)),  # src (source tile)
                pl.BlockSpec((tile_n, 1), lambda i, j: (i, 0)),        # norm_r (dest tile)
            ],
            out_specs=pl.BlockSpec((tile_n, f_out_p), lambda i, j: (i, 0))),
        compiler_params=pltpu.CompilerParams(
            dimension_semantics=("parallel", "arbitrary"),
            vmem_limit_bytes=_vmem_limit(p3_vmem)),
    )(adj_p, src, norm_r_p)

    return out_p[:N, :f_out]


def imlinear_bn_ref(features, weight, gamma, beta, adj):
    h = features @ weight.T
    mean = h.mean(axis=0, keepdims=True)
    var = ((h - mean) ** 2).mean(axis=0, keepdims=True)
    h = (h - mean) / jnp.sqrt(var + BN_EPS) * gamma + beta
    out_deg = adj.sum(axis=1)
    in_deg = adj.sum(axis=0)
    h = h * (jnp.maximum(out_deg, 1.0) ** -0.5)[:, None]
    rst = adj.T @ h
    return rst * (jnp.maximum(in_deg, 1.0) ** -0.5)[:, None]


if __name__ == "__main__":
    N, IN_SIZE, OUT_SIZE = 8, 32, 16

    key = jax.random.PRNGKey(0)
    k_x, k_w, k_g = jax.random.split(key, 3)

    features = jax.random.normal(k_x, (N, IN_SIZE), dtype=jnp.float32)

    # nn.Linear(in_size, out_size, bias=False): weight (out_size, in_size),
    # uniform init in [-1/sqrt(in), 1/sqrt(in)].
    bound = 1.0 / (IN_SIZE ** 0.5)
    weight = jax.random.uniform(k_w, (OUT_SIZE, IN_SIZE),
                                minval=-bound, maxval=bound, dtype=jnp.float32)

    # nn.BatchNorm1d defaults at init: gamma = 1, beta = 0.
    gamma = jnp.ones((OUT_SIZE,), dtype=jnp.float32)
    beta = jnp.zeros((OUT_SIZE,), dtype=jnp.float32)

    # Deterministic random directed graph as a dense 0/1 adjacency matrix.
    adj = (jax.random.uniform(k_g, (N, N)) < 0.4).astype(jnp.float32)

    out = imlinear_bn(features, weight, gamma, beta, adj)
    out = jax.block_until_ready(out)

    ref = imlinear_bn_ref(features, weight, gamma, beta, adj)
    assert out.shape == (N, OUT_SIZE)
    # bf16 MXU operands + bf16 h/src storage => looser tolerance than pure-f32 1e-4.
    assert jnp.allclose(out, ref, atol=5e-2, rtol=5e-2), float(jnp.max(jnp.abs(out - ref)))

    print("KERNEL_OK")
</pallas_src>

<mosaic_0001>
module attributes {stable_mosaic.version = 11 : i64} {
  func.func @_linear_stats_kernel(%arg0: i32, %arg1: i32, %arg2: memref<8x128xbf16, #tpu.memory_space<vmem>>, %arg3: memref<128x128xbf16, #tpu.memory_space<vmem>>, %arg4: memref<8x128xbf16, #tpu.memory_space<vmem>>, %arg5: memref<8x128xf32, #tpu.memory_space<vmem>>) attributes {dimension_semantics = [#tpu.dimension_semantics<parallel>, #tpu.dimension_semantics<arbitrary>], iteration_bounds = array<i64: 1, 1>, scalar_prefetch = 0 : i64, scratch_operands = 0 : i64, tpu.core_type = #tpu.core_type<tc>, window_params = [{transform_indices = @transform_0, window_bounds = array<i64: 8, 128>}, {pipeline_mode = #tpu.pipeline_mode<synchronous>, transform_indices = @transform_1, window_bounds = array<i64: 128, 128>}, {transform_indices = @transform_2, window_bounds = array<i64: 8, 128>}, {transform_indices = @transform_3, window_bounds = array<i64: 8, 128>}]} {
    %c0 = arith.constant 0 : index
    %c0_0 = arith.constant 0 : index
    %0 = vector.load %arg2[%c0, %c0_0] : memref<8x128xbf16, #tpu.memory_space<vmem>>, vector<8x128xbf16>
    %c0_1 = arith.constant 0 : index
    %c0_2 = arith.constant 0 : index
    %1 = vector.load %arg3[%c0_1, %c0_2] : memref<128x128xbf16, #tpu.memory_space<vmem>>, vector<128x128xbf16>
    %cst = arith.constant dense<0.000000e+00> : vector<8x128xf32>
    %2 = tpu.matmul %0, %1, %cst {dimension_numbers = #tpu.dot_dimension_numbers<[1], [0], [0], [1], [0, 0, 1, 1], [], []>} : vector<8x128xbf16>, vector<128x128xbf16>, vector<8x128xf32> -> vector<8x128xf32>
    %3 = arith.truncf %2 : vector<8x128xf32> to vector<8x128xbf16>
    %c0_3 = arith.constant 0 : index
    %c0_4 = arith.constant 0 : index
    %4 = vector.load %arg4[%c0_3, %c0_4] : memref<8x128xbf16, #tpu.memory_space<vmem>>, vector<8x128xbf16>
    tpu.vector_store %arg4[%c0_3, %c0_4], %3 {strides = array<i32>} : memref<8x128xbf16, #tpu.memory_space<vmem>>, vector<8x128xbf16>,
    %c0_i32 = arith.constant 0 : i32
    %5 = arith.cmpi eq, %arg1, %c0_i32 : i32
    %6 = arith.extui %5 : i1 to i32
    %c0_i32_5 = arith.constant 0 : i32
    %7 = arith.cmpi ne, %6, %c0_i32_5 : i32
    scf.if %7 {
      %cst_15 = arith.constant 0.000000e+00 : f32
      %19 = vector.broadcast %cst_15 : f32 to vector<8x128xf32>
      %c0_16 = arith.constant 0 : index
      %c0_17 = arith.constant 0 : index
      %20 = vector.load %arg5[%c0_16, %c0_17] : memref<8x128xf32, #tpu.memory_space<vmem>>, vector<8x128xf32>
      tpu.vector_store %arg5[%c0_16, %c0_17], %19 {strides = array<i32>} : memref<8x128xf32, #tpu.memory_space<vmem>>, vector<8x128xf32>,
    } else {
    }
    %c0_6 = arith.constant 0 : index
    %c0_7 = arith.constant 0 : index
    %8 = vector.load %arg5[%c0_6, %c0_7] : memref<8x128xf32, #tpu.memory_space<vmem>>, vector<1x128xf32>
    %cst_8 = arith.constant dense<0.000000e+00> : vector<128xf32>
    %9 = vector.multi_reduction <add>, %2, %cst_8 [0] : vector<8x128xf32> to vector<128xf32>
    %10 = vector.shape_cast %9 : vector<128xf32> to vector<1x128xf32>
    %11 = arith.addf %8, %10 : vector<1x128xf32>
    %c0_9 = arith.constant 0 : index
    %c0_10 = arith.constant 0 : index
    %12 = vector.load %arg5[%c0_9, %c0_10] : memref<8x128xf32, #tpu.memory_space<vmem>>, vector<1x128xf32>
    tpu.vector_store %arg5[%c0_9, %c0_10], %11 {strides = array<i32>} : memref<8x128xf32, #tpu.memory_space<vmem>>, vector<1x128xf32>,
    %c1 = arith.constant 1 : index
    %c0_11 = arith.constant 0 : index
    %13 = vector.load %arg5[%c1, %c0_11] : memref<8x128xf32, #tpu.memory_space<vmem>>, vector<1x128xf32>
    %14 = arith.mulf %2, %2 : vector<8x128xf32>
    %cst_12 = arith.constant dense<0.000000e+00> : vector<128xf32>
    %15 = vector.multi_reduction <add>, %14, %cst_12 [0] : vector<8x128xf32> to vector<128xf32>
    %16 = vector.shape_cast %15 : vector<128xf32> to vector<1x128xf32>
    %17 = arith.addf %13, %16 : vector<1x128xf32>
    %c1_13 = arith.constant 1 : index
    %c0_14 = arith.constant 0 : index
    %18 = vector.load %arg5[%c1_13, %c0_14] : memref<8x128xf32, #tpu.memory_space<vmem>>, vector<1x128xf32>
    tpu.vector_store %arg5[%c1_13, %c0_14], %17 {strides = array<i32>} : memref<8x128xf32, #tpu.memory_space<vmem>>, vector<1x128xf32>,
    return
  }
  func.func @transform_0(%arg0: i32, %arg1: i32) -> (i32, i32) {
    %c1_i32 = arith.constant 1 : i32
    %0 = arith.muli %arg0, %c1_i32 : i32
    %1 = arith.addi %0, %arg1 : i32
    %c0_i32 = arith.constant 0 : i32
    %c0_i32_0 = arith.constant 0 : i32
    return %1, %c0_i32 : i32, i32
  }
  func.func @transform_1(%arg0: i32, %arg1: i32) -> (i32, i32) {
    %c0_i32 = arith.constant 0 : i32
    %c0_i32_0 = arith.constant 0 : i32
    %c0_i32_1 = arith.constant 0 : i32
    return %c0_i32, %c0_i32_0 : i32, i32
  }
  func.func @transform_2(%arg0: i32, %arg1: i32) -> (i32, i32) {
    %c1_i32 = arith.constant 1 : i32
    %0 = arith.muli %arg0, %c1_i32 : i32
    %1 = arith.addi %0, %arg1 : i32
    %c0_i32 = arith.constant 0 : i32
    %c0_i32_0 = arith.constant 0 : i32
    return %1, %c0_i32 : i32, i32
  }
  func.func @transform_3(%arg0: i32, %arg1: i32) -> (i32, i32) {
    %c0_i32 = arith.constant 0 : i32
    %c0_i32_0 = arith.constant 0 : i32
    return %arg0, %c0_i32 : i32, i32
  }
}

</mosaic_0001>

<bundles_post_ra>
// kernel: tpu_custom_call.1
= control target key start
LH: loop header
LB: loop body
LE: loop exit
PB: predicated region body
PF: predicated region fallthrough
CT: control target
= control target key end

     0   :  { %9 = vsyncpa [#allocation3], 0  ;;  %s392_s0 = inlined_call_operand.hbm [shape: bf16[8,128], index: 0, kind: input, shape index: {}]   ;;  %s393_s1 = inlined_call_operand.hbm [shape: bf16[128,128], index: 1, kind: input, shape index: {}]   ;;  %s394_s2 = inlined_call_operand.hbm [shape: bf16[8,128], index: 2, kind: output, shape index: {0}]   ;;  %s395_s3 = inlined_call_operand.hbm [shape: f32[8,128], index: 3, kind: output, shape index: {1}]  }
   0x1   :  { %10 = vsyncpa [#allocation6], 0 }
   0x2   :  { %11 = vsyncpa [#allocation4], 0 }
   0x3   :  { %12 = vsyncpa [#allocation9], 0  ;;  %s352_s12 = smov [#allocation2]   ;;  %s353_s14 = smov [#allocation5]  }
   0x4   :  { %s22_s13 = sshll.u32 %s352_s12, 4  ;;  %s31_s15 = sshll.u32 %s353_s14, 4  ;;  %s23_s13 = int_to_ptr.vmem [resolvable:$true] %s22_s13  ;;  %s32_s15 = int_to_ptr.vmem [resolvable:$true] %s31_s15 }
   0x5   :  { %s272_s16 = scalar_lea.vmem %s23_s13, 64  ;;  %p277_p1 = scmp.lt.s32.totalorder %s23_s13, %s23_s13 }
   0x6   :  { %p273_p0 = scmp.ne.s32.totalorder %s23_s13, %s272_s16  ;;  %p278_p2 = scmp.lt.s32.totalorder %s272_s16, %s272_s16 }
   0x8   :  { %p279_p3 = por %p278_p2, %p277_p1 }
   0xa   :  { %p280_p4 = pnand %p279_p3, %p273_p0 }
   0xc   :  { %283 = shalt.err (!%p280_p4)
}
   0xd   :  { %25 = dma.hbm_to_vmem [thread:$0]  %s392_s0, 64, %s23_s13, [#allocation3]  }
   0xe   :  { %s292_s19 = scalar_lea.vmem %s32_s15, 1024  ;;  %p297_p6 = scmp.lt.s32.totalorder %s32_s15, %s32_s15 }
   0xf   :  { %p293_p5 = scmp.ne.s32.totalorder %s32_s15, %s292_s19  ;;  %p298_p7 = scmp.lt.s32.totalorder %s292_s19, %s292_s19 }
  0x11   :  { %p299_p8 = por %p298_p7, %p297_p6 }
  0x13   :  { %p300_p9 = pnand %p299_p8, %p293_p5 }
  0x15   :  { %303 = shalt.err (!%p300_p9)
}
  0x16   :  { %s354_s20 = smov 64   ;;  %s355_s21 = smov 4  }
  0x17   :  { %37 = dma.hbm_to_vmem [thread:$0]  %s393_s1, 1024, %s32_s15, [#allocation6], %s354_s20, %s354_s20, %s355_s21  }
  0x18   :  { %344 = dma.done.wait [#allocation3], 64  }
  0x19   :  { %345 = vsyncadd [#allocation3], 4294967232 }
  0x1a   :  { %346 = dma.done.wait [#allocation6], 1024  }
  0x1b   :  { %347 = vsyncadd [#allocation6], 4294966272  ;;  %v356_v0 = vmov 0.0   ;;  %vm357_vm0 = vmmov 0   ;;  %v256_v1 = vld [vmem:[#allocation5 + $0x38] sm:$0xff]   ;;  %v257_v2 = vld [vmem:[#allocation5 + $0x30] sm:$0xff]  }
  0x1c   :  { %228 = vmatprep.subr.bf16.mxu0 %v356_v0  ;;  %158 = vst [vmem:[#allocation8] sm:$0xff] %v356_v0  ;;  %244 = vmatprep.mubr.msk.bf16.mxu0 %vm357_vm0, %v356_v0  ;;  %v258_v3 = vld [vmem:[#allocation5 + $0x28] sm:$0xff]   ;;  %v259_v4 = vld [vmem:[#allocation5 + $0x20] sm:$0xff]   ;;  %v260_v5 = vld [vmem:[#allocation5 + $0x18] sm:$0xff]   ;;  %s358_s0 = smov [#allocation7]  }
  0x1d   :  { %229 = vmatpush3.bf16.msra.mxu0 %v256_v1  ;;  %v261_v6 = vld [vmem:[#allocation5 + $0x10] sm:$0xff]   ;;  %v262_v7 = vld [vmem:[#allocation5 + $0x8] sm:$0xff]   ;;  %v263_v8 = vld [vmem:[#allocation5] sm:$0xff]   ;;  %s187_s1 = sshll.u32 %s358_s0, 4  ;;  %s188_s1 = int_to_ptr.vmem [resolvable:$true] %s187_s1 }
  0x1e   :  { %230 = vmatprep.subr.bf16.mxu0 %v356_v0  ;;  %v47_v9 = vld [vmem:[#allocation2] sm:$0xf]  ;;  %s304_s24 = scalar_lea.vmem %s188_s1, 64  ;;  %p309_p11 = scmp.lt.s32.totalorder %s188_s1, %s188_s1 }
  0x1f   :  { %p305_p10 = scmp.ne.s32.totalorder %s188_s1, %s304_s24  ;;  %p310_p12 = scmp.lt.s32.totalorder %s304_s24, %s304_s24 }
  0x21   :  { %231 = vmatpush3.bf16.msra.mxu0 %v257_v2  ;;  %p311_p13 = por %p310_p12, %p309_p11 }
  0x22   :  { %232 = vmatprep.subr.bf16.mxu0 %v356_v0 }
  0x23   :  { %p312_p0 = pnand %p311_p13, %p305_p10 }
  0x25   :  { %233 = vmatpush3.bf16.msra.mxu0 %v258_v3 }
  0x26   :  { %234 = vmatprep.subr.bf16.mxu0 %v356_v0 }
  0x29   :  { %235 = vmatpush3.bf16.msra.mxu0 %v259_v4 }
  0x2a   :  { %236 = vmatprep.subr.bf16.mxu0 %v356_v0 }
  0x2d   :  { %237 = vmatpush3.bf16.msra.mxu0 %v260_v5 }
  0x2e   :  { %238 = vmatprep.subr.bf16.mxu0 %v356_v0 }
  0x31   :  { %239 = vmatpush3.bf16.msra.mxu0 %v261_v6 }
  0x32   :  { %240 = vmatprep.subr.bf16.mxu0 %v356_v0 }
  0x35   :  { %241 = vmatpush3.bf16.msra.mxu0 %v262_v7 }
  0x36   :  { %242 = vmatprep.subr.bf16.mxu0 %v356_v0 }
  0x39   :  { %243 = vmatpush3.bf16.msra.mxu0 %v263_v8 }
  0x3c   :  { %245 = vmatmul.mubr.bf16.vlgmr.msra.gmra.mxu0 %v47_v9 }
  0xfc   :  { %v146_v10 = vpop.f32.mrf.mxu0 }
  0xfd   :  { %v160_v11 = vrot.slane %v146_v10, 4  ;;  %v169_v12 = vmul.f32 %v146_v10, %v146_v10  ;;  %v152_v13 = vpack.c.bf16 %v146_v10, %v146_v10 }
  0xfe   :  { %v246_v14 = vpop.f32.mrf.mxu0 }
  0xff   :  { %v161_v15 = vadd.f32 %v160_v11, %v146_v10  ;;  %v170_v16 = vrot.slane %v169_v12, 4  ;;  %153 = vst [vmem:[#allocation7] sm:$0xf] %v152_v13 }
 0x100   :  { %v149_v17 = vpop.f32.mrf.mxu0 }
 0x101   :  { %315 = shalt.err (!%p312_p0)
}
 0x102   :  { %190 = dma.vmem_to_hbm [thread:$0]  %s188_s1, 64, %s394_s2, [#allocation4]   ;;  %v162_v18 = vrot.slane %v161_v15, 2  ;;  %v171_v19 = vadd.f32 %v170_v16, %v169_v12  ;;  %v247_v20 = vpop.f32.mrf.mxu0  ;;  %v159_v25 = vld [vmem:[#allocation8] sm:$0x1] }
 0x103   :  { %v168_v28 = vld [vmem:[#allocation8 + $0x1] sm:$0x1]  ;;  %s359_s27 = smov [#allocation8]  }
 0x104   :  { %v163_v21 = vadd.f32 %v162_v18, %v161_v15  ;;  %v172_v22 = vrot.slane %v171_v19, 2  ;;  %s197_s28 = sshll.u32 %s359_s27, 4  ;;  %s198_s28 = int_to_ptr.vmem [resolvable:$true] %s197_s28 }
 0x105   :  { %s324_s2 = scalar_lea.vmem %s198_s28, 128  ;;  %p329_p2 = scmp.lt.s32.totalorder %s198_s28, %s198_s28 }
 0x106   :  { %v164_v23 = vrot.slane %v163_v21, 1  ;;  %v173_v24 = vadd.f32 %v172_v22, %v171_v19  ;;  %p325_p1 = scmp.ne.s32.totalorder %s198_s28, %s324_s2  ;;  %p330_p3 = scmp.lt.s32.totalorder %s324_s2, %s324_s2 }
 0x108   :  { %v165_v26 = vadd.f32 %v164_v23, %v163_v21  ;;  %v174_v27 = vrot.slane %v173_v24, 1  ;;  %p331_p4 = por %p330_p3, %p329_p2 }
 0x10a   :  { %v175_v29 = vadd.f32 %v174_v27, %v173_v24  ;;  %v166_v30 = vadd.f32 %v165_v26, %v159_v25  ;;  %p332_p5 = pnand %p331_p4, %p325_p1 }
 0x10c   :  { %167 = vst [vmem:[#allocation8] sm:$0x1] %v166_v30  ;;  %v176_v31 = vadd.f32 %v175_v29, %v168_v28 }
 0x10e   :  { %177 = vst [vmem:[#allocation8 + $0x1] sm:$0x1] %v176_v31 }
 0x10f   :  { %335 = shalt.err (!%p332_p5)
}
 0x110   :  { %200 = dma.vmem_to_hbm [thread:$0]  %s198_s28, 128, %s395_s3, [#allocation9]  }
 0x111   :  { %348 = dma.done.wait [#allocation4], 64  }
 0x112   :  { %349 = vsyncadd [#allocation4], 4294967232 }
 0x113   :  { %350 = dma.done.wait [#allocation9], 128  }
 0x114   :  { %351 = vsyncadd [#allocation9], 4294967168 }
 0x115   :  { %207 = vsyncpa [#allocation3], 1 }
 0x116   :  { %208 = vsyncpa [#allocation6], 1 }
 0x117   :  { %209 = vsyncpa [#allocation4], 1 }
 0x118   :  { %210 = vsyncpa [#allocation9], 1 }

</bundles_post_ra>
